<compile_context>
chip_gen: v5e
topology: v5e:2x2
jax: 0.10.0
libtpu: 0.0.40
codegen_flags: <defaults>
</compile_context>

<pallas_src>
import jax
import jax.numpy as jnp
from jax.experimental import pallas as pl
from jax.experimental.pallas import tpu as pltpu


def _round_up(n, m):
    return -(-n // m) * m


def _vmem_budget_bytes():
    """Generation-aware scoped-VMEM budget with headroom for compiler scratch."""
    cap = 64 * 2**20  # conservative fallback = v7x per-TC physical VMEM
    try:
        info = pltpu.get_tpu_info()
        cap = int(getattr(info, "vmem_capacity_bytes", cap))
    except Exception:
        pass
    if cap < 32 * 2**20:
        cap = 64 * 2**20
    # ~52 MiB on v7x (64 MiB), ~105 MiB on v5e/v6e (128 MiB)
    return int(min(cap * 0.82, cap - (8 << 20)))


# ----------------------------- kernels ---------------------------------------------


def _ffn_kernel_resident(x_ref, w1_ref, b1_ref, w2_ref, b2_ref, o_ref):
    """Weights fully VMEM-resident; one grid axis over row tiles."""
    x = x_ref[...]                                                    # (tm, Hp)
    h = jnp.dot(x, w1_ref[...], preferred_element_type=jnp.float32)
    h = jnp.maximum(h + b1_ref[...].astype(jnp.float32), 0.0).astype(w2_ref.dtype)
    y = jnp.dot(h, w2_ref[...], preferred_element_type=jnp.float32)
    y = y + b2_ref[...].astype(jnp.float32) + x.astype(jnp.float32)   # residual in f32
    o_ref[...] = y.astype(o_ref.dtype)


def _ffn_kernel_chunked_f32out(x_ref, w1_ref, b1_ref, w2_ref, b2_ref, o_ref):
    """Hidden-dim chunked; f32 output tile doubles as the accumulator (no scratch)."""
    c = pl.program_id(1)                                              # reduction index
    x = x_ref[...]                                                    # (tm, Hp)
    h = jnp.dot(x, w1_ref[...], preferred_element_type=jnp.float32)   # (tm, tc)
    h = jnp.maximum(h + b1_ref[...].astype(jnp.float32), 0.0).astype(w2_ref.dtype)
    part = jnp.dot(h, w2_ref[...], preferred_element_type=jnp.float32)  # (tm, Hp)

    @pl.when(c == 0)
    def _init_with_residual():
        o_ref[...] = x.astype(jnp.float32) + b2_ref[...].astype(jnp.float32) + part

    @pl.when(c > 0)
    def _accumulate():
        o_ref[...] = o_ref[...] + part


def _ffn_kernel_chunked_acc(x_ref, w1_ref, b1_ref, w2_ref, b2_ref, o_ref, acc_ref):
    """Hidden-dim chunked with an f32 scratch accumulator (sub-f32 output dtypes)."""
    c = pl.program_id(1)

    @pl.when(c == 0)
    def _init():
        acc_ref[...] = jnp.zeros_like(acc_ref)

    x = x_ref[...]
    h = jnp.dot(x, w1_ref[...], preferred_element_type=jnp.float32)
    h = jnp.maximum(h + b1_ref[...].astype(jnp.float32), 0.0).astype(w2_ref.dtype)
    acc_ref[...] += jnp.dot(h, w2_ref[...], preferred_element_type=jnp.float32)

    @pl.when(c == pl.num_programs(1) - 1)
    def _finalize():
        o_ref[...] = (x.astype(jnp.float32) + acc_ref[...]
                      + b2_ref[...].astype(jnp.float32)).astype(o_ref.dtype)


# ----------------------------- wrapper ----------------------------------------------


def ffnlayer_forward(x, w1, b1, w2, b2, *, row_tile=None, max_chunk=None,
                     compute_dtype=None, no_chunk=None):
    """Residual FFN forward: y = x + relu(x @ w1 + b1) @ w2 + b2.

    x: (M, H); w1, w2: (H, H) stored [in, out]; b1, b2: (H,) or (1, H).
    compute_dtype: optional (e.g. jnp.bfloat16) to run the MXU path in a lower dtype
    (f32 accumulation is kept); result is cast back to x.dtype.
    no_chunk: None = auto, True = force resident weights, False = force chunking.
    """
    M, H = x.shape
    orig_dtype = x.dtype
    if compute_dtype is not None:
        x, w1, b1, w2, b2 = (a.astype(compute_dtype) for a in (x, w1, b1, w2, b2))
    out_dtype = x.dtype
    b1 = jnp.reshape(b1, (1, -1))
    b2 = jnp.reshape(b2, (1, -1))

    x_item = jnp.dtype(x.dtype).itemsize
    w_item = jnp.dtype(w1.dtype).itemsize
    o_item = jnp.dtype(out_dtype).itemsize
    b_item = jnp.dtype(b1.dtype).itemsize

    budget = _vmem_budget_bytes()
    use_acc_scratch = jnp.dtype(out_dtype) != jnp.dtype(jnp.float32)

    # Sub-32-bit dtypes pack rows along sublanes: row tile is a multiple of the packed
    # sublane tile (8 for f32, 16 for bf16, 32 for int8/fp8).
    row_unit = 8 * max(1, 4 // max(x_item, 1))

    Hp_res = _round_up(H, 128)                 # resident-weights padding (lane-dense)
    Hp_chk = _round_up(max(H, 256), 256)       # chunked padding -> tc >= 256 selectable

    def nochunk_bytes(tm, Hp):
        return (2 * tm * Hp * x_item           # x row tile (double-buffered)
                + 2 * tm * Hp * o_item         # output row tile
                + 4 * Hp * Hp * w_item         # W1 + W2 (budgeted double-buffered)
                + 4 * Hp * b_item              # biases
                + 2 * tm * Hp * 4)             # f32 hidden + second-matmul result

    def chunk_bytes(tm, tc, Hp, with_acc):
        return (2 * tm * Hp * x_item
                + 2 * tm * Hp * o_item
                + 4 * Hp * tc * w_item                 # W1/W2 chunks, double-buffered
                + 2 * (tc + Hp) * b_item
                + (tm * Hp * 4 if with_acc else 0)     # f32 accumulator scratch
                + tm * tc * 4                          # f32 hidden chunk
                + tm * Hp * 4)                         # second matmul f32 result pre-+=

    # ---- row tile -------------------------------------------------------------------
    tm_target = row_tile if row_tile is not None else (512 if x_item <= 2 else 256)
    tm = min(max(row_unit, _round_up(tm_target, row_unit)), _round_up(M, row_unit))
    # keep >= 2 row tiles so the "parallel" axis shards across v7x's two TensorCores
    if M > row_unit and _round_up(M, tm) // tm < 2:
        tm = max(row_unit, _round_up(tm // 2, row_unit))
    # shrink tm until the smallest chunked configuration fits the VMEM budget
    while tm > row_unit and chunk_bytes(tm, 256, Hp_chk, use_acc_scratch) > budget:
        tm = max(row_unit, _round_up(tm // 2, row_unit))

    # ---- path selection: weights fully resident vs hidden-dim chunking ---------------
    if no_chunk is None:
        use_nochunk = nochunk_bytes(tm, Hp_res) <= budget
    else:
        use_nochunk = bool(no_chunk)
    Hp = Hp_res if use_nochunk else Hp_chk

    Mp = _round_up(M, tm)
    n_row_tiles = Mp // tm

    if use_nochunk:
        tc = Hp
        n_chunks = 1
    else:
        cap = max_chunk if max_chunk is not None else (1024 if budget > (96 << 20) else 512)
        cap = max(256, (min(cap, Hp) // 256) * 256)
        candidates = [c for c in range(256, cap + 1, 256) if Hp % c == 0]
        tc = 256
        for c in sorted(candidates, reverse=True):
            if chunk_bytes(tm, c, Hp, use_acc_scratch) <= budget:
                tc = c
                break
        n_chunks = Hp // tc

    # ---- zero-pad (padded rows/cols sliced off; zero weight/bias cols keep the valid
    # region numerically identical) -----------------------------------------------------
    def pad2(a, r, c):
        pr, pc = r - a.shape[0], c - a.shape[1]
        return jnp.pad(a, ((0, pr), (0, pc))) if (pr or pc) else a

    xp = pad2(x, Mp, Hp)
    w1p = pad2(w1, Hp, Hp)
    w2p = pad2(w2, Hp, Hp)
    b1p = pad2(b1, 1, Hp)
    b2p = pad2(b2, 1, Hp)

    need = (nochunk_bytes(tm, Hp) if use_nochunk
            else chunk_bytes(tm, tc, Hp, use_acc_scratch))
    vmem_limit = int(min(budget, max(int(need * 1.4) + (2 << 20), 16 << 20)))

    weight_passes = 1 if use_nochunk else n_row_tiles   # weight re-streaming per row tile
    cost = pl.CostEstimate(
        flops=int(4 * Mp * Hp * Hp),                    # two Mp x Hp x Hp matmuls
        transcendentals=0,
        bytes_accessed=int(Mp * Hp * (x_item + o_item)
                           + weight_passes * 2 * Hp * Hp * w_item
                           + 2 * Hp * b_item),
    )

    if use_nochunk:
        grid = (n_row_tiles,)
        in_specs = [
            pl.BlockSpec((tm, Hp), lambda i: (i, 0)),   # x row tile
            pl.BlockSpec((Hp, Hp), lambda i: (0, 0)),   # W1 (VMEM-resident)
            pl.BlockSpec((1, Hp), lambda i: (0, 0)),    # b1
            pl.BlockSpec((Hp, Hp), lambda i: (0, 0)),   # W2 (VMEM-resident)
            pl.BlockSpec((1, Hp), lambda i: (0, 0)),    # b2
        ]
        out_specs = pl.BlockSpec((tm, Hp), lambda i: (i, 0))
        kernel = _ffn_kernel_resident
        scratch = []
        dims = ("parallel",)
    else:
        grid = (n_row_tiles, n_chunks)                  # reduction (chunk) axis last
        in_specs = [
            pl.BlockSpec((tm, Hp), lambda i, c: (i, 0)),   # x row tile
            pl.BlockSpec((Hp, tc), lambda i, c: (0, c)),   # W1 column chunk
            pl.BlockSpec((1, tc), lambda i, c: (0, c)),    # b1 chunk
            pl.BlockSpec((tc, Hp), lambda i, c: (c, 0)),   # W2 row chunk
            pl.BlockSpec((1, Hp), lambda i, c: (0, 0)),    # b2 (resident)
        ]
        out_specs = pl.BlockSpec((tm, Hp), lambda i, c: (i, 0))
        if use_acc_scratch:
            kernel = _ffn_kernel_chunked_acc
            scratch = [pltpu.VMEM((tm, Hp), jnp.float32)]
        else:
            kernel = _ffn_kernel_chunked_f32out          # accumulate into o_ref directly
            scratch = []
        dims = ("parallel", "arbitrary")

    out = pl.pallas_call(
        kernel,
        out_shape=jax.ShapeDtypeStruct((Mp, Hp), out_dtype),
        grid_spec=pltpu.PrefetchScalarGridSpec(
            num_scalar_prefetch=0,
            grid=grid,
            in_specs=in_specs,
            out_specs=out_specs,
            scratch_shapes=scratch,
        ),
        compiler_params=pltpu.CompilerParams(
            dimension_semantics=dims,
            vmem_limit_bytes=vmem_limit,
        ),
        cost_estimate=cost,
    )(xp, w1p, b1p, w2p, b2p)

    y = out[:M, :H]
    return y.astype(orig_dtype) if y.dtype != orig_dtype else y


def reference_forward(x, w1, b1, w2, b2):
    hp = jax.lax.Precision.HIGHEST
    h = jnp.maximum(jnp.dot(x, w1, precision=hp) + jnp.reshape(b1, (1, -1)), 0.0)
    return x + jnp.dot(h, w2, precision=hp) + jnp.reshape(b2, (1, -1))


if __name__ == "__main__":
    key = jax.random.PRNGKey(0)

    # Shapes consistent with ffnlayer(size, dropout): x is (batch, seq, size).
    batch, seq, size = 2, 8, 32
    dropout = 0.1  # identity at inference (eval mode); not applied in-kernel

    k_x, k_w1, k_b1, k_w2, k_b2 = jax.random.split(key, 5)
    bound = 1.0 / float(size) ** 0.5
    x = jax.random.normal(k_x, (batch, seq, size), dtype=jnp.float32)
    # Weights stored [in, out] == transpose of torch.nn.Linear.weight.
    w1 = jax.random.uniform(k_w1, (size, size), jnp.float32, -bound, bound)
    b1 = jax.random.uniform(k_b1, (size,), jnp.float32, -bound, bound)
    w2 = jax.random.uniform(k_w2, (size, size), jnp.float32, -bound, bound)
    b2 = jax.random.uniform(k_b2, (size,), jnp.float32, -bound, bound)

    x2d = x.reshape(batch * seq, size)
    y = ffnlayer_forward(x2d, w1, b1, w2, b2).reshape(batch, seq, size)
    jax.block_until_ready(y)
    y_ref = reference_forward(x2d, w1, b1, w2, b2).reshape(batch, seq, size)
    assert jnp.allclose(y, y_ref, atol=5e-3, rtol=5e-3), "mismatch (resident path)"

    # Exercise the chunked path (reduction grid axis, accumulate into f32 output tile).
    H2, M2 = 512, 64
    kk = jax.random.split(jax.random.PRNGKey(1), 5)
    b2d = 1.0 / float(H2) ** 0.5
    x2 = jax.random.normal(kk[0], (M2, H2), dtype=jnp.float32)
    w1c = jax.random.uniform(kk[1], (H2, H2), jnp.float32, -b2d, b2d)
    b1c = jax.random.uniform(kk[2], (H2,), jnp.float32, -b2d, b2d)
    w2c = jax.random.uniform(kk[3], (H2, H2), jnp.float32, -b2d, b2d)
    b2c = jax.random.uniform(kk[4], (H2,), jnp.float32, -b2d, b2d)
    yc = ffnlayer_forward(x2, w1c, b1c, w2c, b2c, no_chunk=False, max_chunk=256)
    yc_ref = reference_forward(x2, w1c, b1c, w2c, b2c)
    assert jnp.allclose(yc, yc_ref, atol=5e-3, rtol=5e-3), "mismatch (chunked f32 path)"

    # Exercise the chunked path with bf16 activations/weights (f32 scratch accumulator).
    xb = x2.astype(jnp.bfloat16)
    w1b, b1b, w2b, b2b = (a.astype(jnp.bfloat16) for a in (w1c, b1c, w2c, b2c))
    yb = ffnlayer_forward(xb, w1b, b1b, w2b, b2b, no_chunk=False, max_chunk=256)
    yb_ref = reference_forward(xb.astype(jnp.float32), w1b.astype(jnp.float32),
                               b1b.astype(jnp.float32), w2b.astype(jnp.float32),
                               b2b.astype(jnp.float32))
    assert jnp.allclose(yb.astype(jnp.float32), yb_ref, atol=1e-1, rtol=1e-1), \
        "mismatch (chunked bf16 path)"

    print("KERNEL_OK")
</pallas_src>

<mosaic_0001>
module attributes {stable_mosaic.version = 11 : i64} {
  func.func @_ffn_kernel_resident(%arg0: i32, %arg1: memref<8x128xf32, #tpu.memory_space<vmem>>, %arg2: memref<128x128xf32, #tpu.memory_space<vmem>>, %arg3: memref<1x128xf32, #tpu.memory_space<vmem>>, %arg4: memref<128x128xf32, #tpu.memory_space<vmem>>, %arg5: memref<1x128xf32, #tpu.memory_space<vmem>>, %arg6: memref<8x128xf32, #tpu.memory_space<vmem>>) attributes {dimension_semantics = [#tpu.dimension_semantics<parallel>], iteration_bounds = array<i64: 2>, scalar_prefetch = 0 : i64, scratch_operands = 0 : i64, tpu.core_type = #tpu.core_type<tc>, window_params = [{transform_indices = @transform_0, window_bounds = array<i64: 8, 128>}, {pipeline_mode = #tpu.pipeline_mode<synchronous>, transform_indices = @transform_1, window_bounds = array<i64: 128, 128>}, {pipeline_mode = #tpu.pipeline_mode<synchronous>, transform_indices = @transform_2, window_bounds = array<i64: 1, 128>}, {pipeline_mode = #tpu.pipeline_mode<synchronous>, transform_indices = @transform_3, window_bounds = array<i64: 128, 128>}, {pipeline_mode = #tpu.pipeline_mode<synchronous>, transform_indices = @transform_4, window_bounds = array<i64: 1, 128>}, {transform_indices = @transform_5, window_bounds = array<i64: 8, 128>}]} {
    %c0 = arith.constant 0 : index
    %c0_0 = arith.constant 0 : index
    %0 = vector.load %arg1[%c0, %c0_0] : memref<8x128xf32, #tpu.memory_space<vmem>>, vector<8x128xf32>
    %c0_1 = arith.constant 0 : index
    %c0_2 = arith.constant 0 : index
    %1 = vector.load %arg2[%c0_1, %c0_2] : memref<128x128xf32, #tpu.memory_space<vmem>>, vector<128x128xf32>
    %cst = arith.constant dense<0.000000e+00> : vector<8x128xf32>
    %2 = tpu.matmul %0, %1, %cst {dimension_numbers = #tpu.dot_dimension_numbers<[1], [0], [0], [1], [0, 0, 1, 1], [], []>} : vector<8x128xf32>, vector<128x128xf32>, vector<8x128xf32> -> vector<8x128xf32>
    %c0_3 = arith.constant 0 : index
    %c0_4 = arith.constant 0 : index
    %3 = vector.load %arg3[%c0_3, %c0_4] : memref<1x128xf32, #tpu.memory_space<vmem>>, vector<1x128xf32>
    %4 = vector.broadcast %3 : vector<1x128xf32> to vector<8x128xf32>
    %5 = arith.addf %2, %4 : vector<8x128xf32>
    %cst_5 = arith.constant 0.000000e+00 : f32
    %6 = vector.broadcast %cst_5 : f32 to vector<8x128xf32>
    %7 = arith.maximumf %5, %6 : vector<8x128xf32>
    %c0_6 = arith.constant 0 : index
    %c0_7 = arith.constant 0 : index
    %8 = vector.load %arg4[%c0_6, %c0_7] : memref<128x128xf32, #tpu.memory_space<vmem>>, vector<128x128xf32>
    %cst_8 = arith.constant dense<0.000000e+00> : vector<8x128xf32>
    %9 = tpu.matmul %7, %8, %cst_8 {dimension_numbers = #tpu.dot_dimension_numbers<[1], [0], [0], [1], [0, 0, 1, 1], [], []>} : vector<8x128xf32>, vector<128x128xf32>, vector<8x128xf32> -> vector<8x128xf32>
    %c0_9 = arith.constant 0 : index
    %c0_10 = arith.constant 0 : index
    %10 = vector.load %arg5[%c0_9, %c0_10] : memref<1x128xf32, #tpu.memory_space<vmem>>, vector<1x128xf32>
    %11 = vector.broadcast %10 : vector<1x128xf32> to vector<8x128xf32>
    %12 = arith.addf %9, %11 : vector<8x128xf32>
    %13 = arith.addf %12, %0 : vector<8x128xf32>
    %c0_11 = arith.constant 0 : index
    %c0_12 = arith.constant 0 : index
    %14 = vector.load %arg6[%c0_11, %c0_12] : memref<8x128xf32, #tpu.memory_space<vmem>>, vector<8x128xf32>
    tpu.vector_store %arg6[%c0_11, %c0_12], %13 {strides = array<i32>} : memref<8x128xf32, #tpu.memory_space<vmem>>, vector<8x128xf32>,
    return
  }
  func.func @transform_0(%arg0: i32) -> (i32, i32) {
    %c0_i32 = arith.constant 0 : i32
    %c0_i32_0 = arith.constant 0 : i32
    return %arg0, %c0_i32 : i32, i32
  }
  func.func @transform_1(%arg0: i32) -> (i32, i32) {
    %c0_i32 = arith.constant 0 : i32
    %c0_i32_0 = arith.constant 0 : i32
    %c0_i32_1 = arith.constant 0 : i32
    return %c0_i32, %c0_i32_0 : i32, i32
  }
  func.func @transform_2(%arg0: i32) -> (i32, i32) {
    %c0_i32 = arith.constant 0 : i32
    %c0_i32_0 = arith.constant 0 : i32
    %c0_i32_1 = arith.constant 0 : i32
    return %c0_i32, %c0_i32_0 : i32, i32
  }
  func.func @transform_3(%arg0: i32) -> (i32, i32) {
    %c0_i32 = arith.constant 0 : i32
    %c0_i32_0 = arith.constant 0 : i32
    %c0_i32_1 = arith.constant 0 : i32
    return %c0_i32, %c0_i32_0 : i32, i32
  }
  func.func @transform_4(%arg0: i32) -> (i32, i32) {
    %c0_i32 = arith.constant 0 : i32
    %c0_i32_0 = arith.constant 0 : i32
    %c0_i32_1 = arith.constant 0 : i32
    return %c0_i32, %c0_i32_0 : i32, i32
  }
  func.func @transform_5(%arg0: i32) -> (i32, i32) {
    %c0_i32 = arith.constant 0 : i32
    %c0_i32_0 = arith.constant 0 : i32
    return %arg0, %c0_i32 : i32, i32
  }
}

</mosaic_0001>

<bundles_post_ra>
// kernel: tpu_custom_call.1
= control target key start
LH: loop header
LB: loop body
LE: loop exit
PB: predicated region body
PF: predicated region fallthrough
CT: control target
= control target key end

     0   :  { %10 = vsyncpa [#allocation3], 0  ;;  %s905_s0 = inlined_call_operand.hbm [shape: f32[16,128], index: 0, kind: input, shape index: {}]   ;;  %s906_s1 = inlined_call_operand.hbm [shape: f32[128,128], index: 1, kind: input, shape index: {}]   ;;  %s907_s2 = inlined_call_operand.vmem [shape: f32[1,128], index: 2, kind: input, shape index: {}]   ;;  %s908_s3 = inlined_call_operand.hbm [shape: f32[128,128], index: 3, kind: input, shape index: {}]   ;;  %s909_s4 = inlined_call_operand.vmem [shape: f32[1,128], index: 4, kind: input, shape index: {}]   ;;  %s910_s5 = inlined_call_operand.hbm [shape: f32[16,128], index: 5, kind: output, shape index: {}]  }
   0x1   :  { %12 = vsyncpa [#allocation3 + $0x1], 0 }
   0x2   :  { %13 = vsyncpa [#allocation6], 0 }
   0x3   :  { %14 = vsyncpa [#allocation4], 0 }
   0x4   :  { %16 = vsyncpa [#allocation4 + $0x1], 0  ;;  %s747_s18 = smov 0   ;;  %s749_s19 = smov 0  }
   0x5   :  { %s751_s20 = smov 0   ;;  %s753_s21 = smov 0  }
   0x6 LB: > { %s174_s24 = sshll.u32 %s906_s1, 4  ;;  %s771_s25 = sadd.s32 4294967295, %s711_s21   ;;  %s711_s21 = sphi %s753_s21, %s921_s21   ;;  %s707_s20 = sphi %s751_s20, %s920_s20   ;;  %s703_s19 = sphi %s749_s19, %s919_s19   ;;  %s699_s18 = sphi %s747_s18, %s918_s18   ;;  %s175_s24 = int_to_ptr.hbm [resolvable:$true] %s174_s24 }
   0x7   : > { %p465_p0 = scmp.ge.s32.totalorder %s711_s21, 1  ;;  %p43_p1 = scmp.eq.s32.totalorder %s771_s25, 0 }
   0x8   : > { %p163_p2 = scmp.lt.s32.totalorder %s711_s21, 3  ;;  %s713_s27 = smov [#allocation5]  }
   0x9   : > { %s176_s28 = sshll.u32 %s713_s27, 4  ;;  %s191_s6 = sshll.u32 %s908_s3, 4  ;;  %s177_s28 = int_to_ptr.vmem [resolvable:$true] %s176_s28  ;;  %s192_s6 = int_to_ptr.hbm [resolvable:$true] %s191_s6 }
   0xa   : > { %p776_p3 = pnand %p465_p0, %p163_p2  ;;  %s714_s7 = smov [#allocation7]  }
   0xb   : > { %s193_s8 = sshll.u32 %s714_s7, 4  ;;  %s715_s9 = smov 128   ;;  %s194_s8 = int_to_ptr.vmem [resolvable:$true] %s193_s8 }
   0xc   : > { %p492_p4 = pneg %p776_p3  ;;  %s716_s10 = smov 8  }
   0xd   : > { %s464_s11 = sadd.s32 4294967294, %s711_s21   ;;  %s790_s12 = sadd.s32 1, %s711_s21  }
   0xe   : > { %p493_p6 = pnand %p492_p4, %p43_p1  ;;  %s26_s13 = ssub.s32 %s711_s21, %s790_s12 }
   0xf   : > { %s29_s14 = sadd.s32 1, %s707_s20  ;;  %p27_p7 = scmp.eq.s32.totalorder %s26_s13, 0 }
  0x10   : > { %495 = dma.hbm_to_vmem [thread:$0]  (!%p493_p6), %s175_s24, 2048, %s177_s28, [#allocation6], %s715_s9, %s715_s9, %s716_s10  }
  0x11   : > { %498 = dma.hbm_to_vmem [thread:$0]  (!%p493_p6), %s192_s6, 2048, %s194_s8, [#allocation6], %s715_s9, %s715_s9, %s716_s10  }
  0x12   : > { %p36_p8 = scmp.ne.s32.totalorder %s707_s20, %s703_s19  ;;  %p37_p9 = scmp.eq.s32.totalorder %s711_s21, 0 }
  0x13   : > { %p42_p10 = scmp.ne.s32.totalorder %s703_s19, %s699_s18  ;;  %p150_p13 = scmp.eq.s32.totalorder %s771_s25, 1 }
  0x14   : > { %s801_s15 = scalar_select %p27_p7, %s707_s20, %s29_s14  }
  0x15   : > { %p803_p11 = por %p37_p9, %p36_p8  ;;  %p809_p12 = por %p43_p1, %p42_p10 }
  0x16   : > { %p156_p0 = scmp.eq.s32.totalorder %s464_s11, 1  ;;  %p509_p2 = scmp.lt.s32.totalorder %s711_s21, 2 }
  0x17   : > { %s210_s22 = sand.u32 1, %s707_s20   ;;  %p816_p4 = por %p150_p13, %p36_p8 }
  0x18   : > { %p820_p6 = por %p156_p0, %p42_p10  ;;  %s469_s27 = sshll.u32 %s210_s22, 3 }
  0x19   : > { %s470_s28 = sshll.u32 %s711_s21, 3  ;;  %s214_s7 = scalar_lea.vmem [#allocation2], %s469_s27 }
  0x1a   : > { %s218_s6 = scalar_lea.hbm %s905_s0, %s470_s28  ;;  %s222_s8 = sshll.u32 %s214_s7, 4  ;;  %s223_s8 = int_to_ptr.vmem [resolvable:$true] %s222_s8 }
  0x1b   : > { %s220_s9 = sshll.u32 %s218_s6, 4  ;;  %p830_p7 = pnand %p509_p2, %p803_p11  ;;  %s221_s9 = int_to_ptr.hbm [resolvable:$true] %s220_s9 }
  0x1c   : > { %s211_s11 = scalar_lea.sflag [#allocation3], %s210_s22  ;;  %s611_s13 = sshra.s32 %s221_s9, 4  ;;  %s612_s13 = int_to_ptr.hbm [resolvable:$true] %s611_s13 }
  0x1d   : > { %s613_s14 = scalar_lea.hbm %s612_s13, 8  ;;  %p615_p9 = pneg %p830_p7 }
  0x1e   : > { %p614_p8 = scmp.ne.s32.totalorder %s612_s13, %s613_s14  ;;  %s618_s29 = scalar_lea.hbm %s905_s0, 16 }
  0x1f   : > { %p619_p11 = scmp.lt.s32.totalorder %s612_s13, %s905_s0  ;;  %p620_p0 = scmp.lt.s32.totalorder %s618_s29, %s613_s14 }
  0x20   : > { %p616_p10 = pnand %p615_p9, %p614_p8 }
  0x21   : > { %p621_p2 = por %p620_p0, %p619_p11 }
  0x22   : > { %p617_p13 = pneg %p616_p10 }
  0x24   : > { %p622_p5 = pnand %p621_p2, %p617_p13 }
  0x26   : > { %625 = shalt.err (!%p622_p5)
}
  0x27   : > { %502 = dma.hbm_to_vmem [thread:$0]  (!%p830_p7), %s221_s9, 128, %s223_s8, %s211_s11  }
  0x28   : > { %231 = sbr.rel (%p776_p3) target bundleno = 343 (0x157), region = 40  ;;  %s847_s22 = sand.u32 (!%p776_p3), 1, %s703_s19  }
  0x29   : > { %s472_s6 = sshll.u32 (!%p776_p3), %s847_s22, 3  ;;  %s234_s7 = scalar_lea.sflag (!%p776_p3), [#allocation3], %s847_s22 }
  0x2a   : > { %s853_s13 = scalar_lea.vmem (!%p776_p3), [#allocation2], %s472_s6 }
  0x2d   : > { %686 = dma.done.wait (%p809_p12), %s234_s7, 128  }
  0x2e   : > { %688 = vsyncadd (%p809_p12), %s234_s7, 4294967168 }
  0x2f   : > { %690 = dma.done.wait (%p43_p1), [#allocation6], 4096  }
  0x30   : > { %692 = vsyncadd (%p43_p1), [#allocation6], 4294963200  ;;  %v291_v0 = vld [vmem:[#allocation5 + $0x78] sm:$0xff]  ;;  %v290_v1 = vld [vmem:[#allocation5 + $0x70] sm:$0xff]  ;;  %s477_s8 = sshll.u32 %s771_s25, 3  ;;  %s274_s28 = scalar_lea.vmem [#allocation8], %s472_s6 }
  0x31   : > { %296 = vmatpush.msra.mxu0 %v291_v0  ;;  %v289_v2 = vld [vmem:[#allocation5 + $0x68] sm:$0xff]  ;;  %v288_v3 = vld [vmem:[#allocation5 + $0x60] sm:$0xff]  ;;  %v332_v4 = vld [vmem:[#allocation7 + $0x78] sm:$0xff]  ;;  %s370_s27 = scalar_lea.hbm %s910_s5, %s477_s8  ;;  %s372_s29 = sshll.u32 %s274_s28, 4  ;;  %s373_s29 = int_to_ptr.vmem [resolvable:$true] %s372_s29 }
  0x32   : > { %v287_v5 = vld [vmem:[#allocation5 + $0x58] sm:$0xff]  ;;  %337 = vmatpush.msra.mxu1 %v332_v4  ;;  %v331_v6 = vld [vmem:[#allocation7 + $0x70] sm:$0xff]  ;;  %v330_v7 = vld [vmem:[#allocation7 + $0x68] sm:$0xff]  ;;  %s374_s30 = sshll.u32 %s370_s27, 4  ;;  %s360_s25 = scalar_lea.sflag [#allocation4], %s847_s22  ;;  %s375_s30 = int_to_ptr.hbm [resolvable:$true] %s374_s30 }
  0x33   : > { %297 = vmatpush.msra.mxu0 %v290_v1  ;;  %v286_v8 = vld [vmem:[#allocation5 + $0x50] sm:$0xff]  ;;  %v329_v9 = vld [vmem:[#allocation7 + $0x60] sm:$0xff]  ;;  %v285_v10 = vld [vmem:[#allocation5 + $0x48] sm:$0xff]  ;;  %s655_s16 = sshra.s32 %s375_s30, 4  ;;  %s661_s17 = scalar_lea.hbm %s910_s5, 16  ;;  %s656_s16 = int_to_ptr.hbm [resolvable:$true] %s655_s16 }
  0x34   : > { %338 = vmatpush.msra.mxu1 %v331_v6  ;;  %v328_v11 = vld [vmem:[#allocation7 + $0x58] sm:$0xff]  ;;  %v284_v12 = vld [vmem:[#allocation5 + $0x40] sm:$0xff]  ;;  %v327_v13 = vld [vmem:[#allocation7 + $0x50] sm:$0xff]  ;;  %s657_s7 = scalar_lea.hbm %s656_s16, 8  ;;  %p662_p12 = scmp.lt.s32.totalorder %s656_s16, %s910_s5 }
  0x35   : > { %298 = vmatpush.msra.mxu0 %v289_v2  ;;  %v283_v14 = vld [vmem:[#allocation5 + $0x38] sm:$0xff]  ;;  %v326_v15 = vld [vmem:[#allocation7 + $0x48] sm:$0xff]  ;;  %v282_v16 = vld [vmem:[#allocation5 + $0x30] sm:$0xff]  ;;  %p658_p1 = scmp.ne.s32.totalorder %s656_s16, %s657_s7  ;;  %p663_p7 = scmp.lt.s32.totalorder %s661_s17, %s657_s7 }
  0x36   : > { %339 = vmatpush.msra.mxu1 %v330_v7  ;;  %v325_v17 = vld [vmem:[#allocation7 + $0x40] sm:$0xff]  ;;  %v281_v18 = vld [vmem:[#allocation5 + $0x28] sm:$0xff]  ;;  %v324_v19 = vld [vmem:[#allocation7 + $0x38] sm:$0xff] }
  0x37   : > { %299 = vmatpush.msra.mxu0 %v288_v3  ;;  %v280_v20 = vld [vmem:[#allocation5 + $0x20] sm:$0xff]  ;;  %v323_v21 = vld [vmem:[#allocation7 + $0x30] sm:$0xff]  ;;  %v279_v22 = vld [vmem:[#allocation5 + $0x18] sm:$0xff]  ;;  %p659_p3 = pnand %p658_p1, %p816_p4  ;;  %p664_p8 = por %p663_p7, %p662_p12 }
  0x38   : > { %340 = vmatpush.msra.mxu1 %v329_v9  ;;  %v322_v23 = vld [vmem:[#allocation7 + $0x28] sm:$0xff]  ;;  %v278_v24 = vld [vmem:[#allocation5 + $0x10] sm:$0xff]  ;;  %v321_v25 = vld [vmem:[#allocation7 + $0x20] sm:$0xff] }
  0x39   : > { %300 = vmatpush.msra.mxu0 %v287_v5  ;;  %v277_v26 = vld [vmem:[#allocation5 + $0x8] sm:$0xff]  ;;  %v320_v27 = vld [vmem:[#allocation7 + $0x18] sm:$0xff]  ;;  %v276_v28 = vld [vmem:[#allocation5] sm:$0xff]  ;;  %p660_p5 = pneg %p659_p3 }
  0x3a   : > { %341 = vmatpush.msra.mxu1 %v328_v11  ;;  %v275_v29 = vld [vmem:[%s853_s13] sm:$0xff]  ;;  %v318_v31 = vld [vmem:[#allocation7 + $0x8] sm:$0xff]  ;;  %v317_v32 = vld [vmem:[#allocation7] sm:$0xff] }
  0x3b   : > { %301 = vmatpush.msra.mxu0 %v286_v8  ;;  %v319_v30 = vld [vmem:[#allocation7 + $0x10] sm:$0xff]  ;;  %p665_p9 = pnand %p664_p8, %p660_p5 }
  0x3c   : > { %342 = vmatpush.msra.mxu1 %v327_v13  ;;  %v549_v33 = vld [vmem:[%s907_s2] ss:$0 sm:$0xff] }
  0x3d   : > { %302 = vmatpush.msra.mxu0 %v285_v10  ;;  %v550_v37 = vld [vmem:[%s909_s4] ss:$0 sm:$0xff] }
  0x3e   : > { %343 = vmatpush.msra.mxu1 %v326_v15 }
  0x3f   : > { %303 = vmatpush.msra.mxu0 %v284_v12 }
  0x40   : > { %344 = vmatpush.msra.mxu1 %v325_v17 }
  0x41   : > { %304 = vmatpush.msra.mxu0 %v283_v14 }
  0x42   : > { %345 = vmatpush.msra.mxu1 %v324_v19 }
  0x43   : > { %305 = vmatpush.msra.mxu0 %v282_v16 }
  0x44   : > { %346 = vmatpush.msra.mxu1 %v323_v21 }
  0x45   : > { %306 = vmatpush.msra.mxu0 %v281_v18 }
  0x46   : > { %347 = vmatpush.msra.mxu1 %v322_v23 }
  0x47   : > { %307 = vmatpush.msra.mxu0 %v280_v20 }
  0x48   : > { %348 = vmatpush.msra.mxu1 %v321_v25 }
  0x49   : > { %308 = vmatpush.msra.mxu0 %v279_v22 }
  0x4a   : > { %349 = vmatpush.msra.mxu1 %v320_v27 }
  0x4b   : > { %309 = vmatpush.msra.mxu0 %v278_v24 }
  0x4c   : > { %350 = vmatpush.msra.mxu1 %v319_v30 }
  0x4d   : > { %310 = vmatpush.msra.mxu0 %v277_v26 }
  0x4e   : > { %351 = vmatpush.msra.mxu1 %v318_v31 }
  0x4f   : > { %311 = vmatpush.msra.mxu0 %v276_v28 }
  0x50   : > { %312 = vmatmul.f32.vlgmr.msra.gmra.mxu0 %v275_v29  ;;  %352 = vmatpush.msra.mxu1 %v317_v32 }
  0xcd   : > { %v313_v34 = vpop.f32.mrf.mxu0 }
  0xce   : > { %v314_v35 = vadd.f32 %v549_v33, %v313_v34 }
  0xd0   : > { %v316_v36 = vmax.f32 %v314_v35, 0.0 }
  0xd2   : > { %353 = vmatmul.f32.vlgmr.msra.gmra.mxu1 %v316_v36 }
 0x14f   : > { %v354_v38 = vpop.f32.mrf.mxu1 }
 0x150   : > { %v355_v39 = vadd.f32 %v550_v37, %v354_v38 }
 0x152   : > { %v357_v40 = vadd.f32 %v355_v39, %v275_v29 }
 0x154   : > { %358 = vst [vmem:[%s274_s28] sm:$0xff] %v357_v40 }
 0x155   : > { %668 = shalt.err (!%p665_p9)
}
 0x156   : > { %490 = dma.vmem_to_hbm [thread:$0]  (%p816_p4), %s373_s29, 128, %s375_s30, %s360_s25  }
 0x157 PF: > { %s386_s22 = sand.u32 1, %s699_s18   ;;  %p917_p10 = scmp.ge.s32.totalorder %s711_s21, 2 }
 0x158   : > { %s387_s9 = scalar_lea.sflag [#allocation4], %s386_s22 }
 0x159   : > { %p504_p13 = pnand %p917_p10, %p820_p6 }
 0x15b   : > { %p505_p11 = pneg %p504_p13 }
 0x15d   : > { %694 = dma.done.wait (%p505_p11), %s387_s9, 128  }
 0x15e   : > { %696 = vsyncadd (%p505_p11), %s387_s9, 4294967168  ;;  %p19_p0 = scmp.ge.s32.totalorder %s790_s12, 4   ;;  %s918_s18 = smov %s703_s19 }
 0x15f   : > { %s919_s19 = smov %s707_s20  ;;  %s920_s20 = smov %s801_s15 }
 0x160   : > { %s921_s21 = smov %s790_s12  ;;  %21 = sbr.rel (!%p19_p0) target bundleno = 6 (0x6), region = 93 }
 0x165   :  { %393 = vsyncpa [#allocation3], 1 }
 0x166   :  { %395 = vsyncpa [#allocation3 + $0x1], 1 }
 0x167   :  { %396 = vsyncpa [#allocation6], 1 }
 0x168   :  { %397 = vsyncpa [#allocation4], 1 }
 0x169   :  { %399 = vsyncpa [#allocation4 + $0x1], 1 }

</bundles_post_ra>
